<compile_context>
chip_gen: v7x
topology: tpu7x:2x2x1
jax: 0.10.0
libtpu: 0.0.40
codegen_flags: <defaults>
</compile_context>

<pallas_src>
import math
import functools

import jax
import jax.numpy as jnp
from jax.experimental import pallas as pl
from jax.experimental.pallas import tpu as pltpu

DROPOUT_P = 0.6  # module default; F.dropout default training=True


def _round_up(x, m):
    return (x + m - 1) // m * m


def _lstm_cell_kernel(xh_ref, c_ref, wu_ref, b_ref, drop_ref, out_ref, *, hp):
    # One fused gate matmul: (Bp, 2*Hp) @ (2*Hp, 4*Hp) -> (Bp, 4*Hp), f32 acc.
    gates = jnp.dot(xh_ref[...], wu_ref[...],
                    preferred_element_type=jnp.float32) + b_ref[...]

    # Gate columns are laid out [f | i | o | g], each Hp wide (Hp % 128 == 0),
    # so every slice below is vreg-aligned.
    f_t = jax.nn.sigmoid(gates[:, 0 * hp:1 * hp])
    i_t = jax.nn.sigmoid(gates[:, 1 * hp:2 * hp])
    o_t = jax.nn.sigmoid(gates[:, 2 * hp:3 * hp])
    g_t = jnp.tanh(gates[:, 3 * hp:4 * hp])

    c_t = c_ref[...] * f_t + i_t * g_t
    # Dropout: drop_ref holds 0 or 1/(1-p) (scale folded in by the wrapper).
    h_t = o_t * jnp.tanh(c_t) * drop_ref[...]

    # Single lane-dense (Bp, 2*Hp) store: [h_t | c_t], split in the wrapper.
    out_ref[...] = jnp.concatenate([h_t, c_t], axis=1).astype(out_ref.dtype)


def lstm_forward(params, x, hidden, pre_cell, dropout_rng):
    """One LSTM-cell step; x/hidden/pre_cell are flattened to (B, -1)."""
    B = x.shape[0]
    x2 = x.reshape(B, -1).astype(jnp.float32)
    h2 = hidden.reshape(B, -1).astype(jnp.float32)
    c2 = pre_cell.reshape(B, -1).astype(jnp.float32)
    H = params["u_f"].shape[0]
    assert x2.shape[1] == H and h2.shape[1] == H and c2.shape[1] == H, (
        "reference module only type-checks when input_size == hidden_size")

    Bp = _round_up(max(B, 8), 8)        # full sublane tiles
    Hp = _round_up(max(H, 128), 128)    # full lane tiles (gate slices aligned)

    # --- pack weights: WU = [[W_f W_i W_o W_c], [U_f U_i U_o U_c]] ----------
    wu = jnp.zeros((2 * Hp, 4 * Hp), jnp.float32)
    bias = jnp.zeros((1, 4 * Hp), jnp.float32)
    gate_params = [
        (params["w_f"], params["u_f"], params["bias1"]),
        (params["w_i"], params["u_i"], params["bias2"]),
        (params["w_o"], params["u_o"], params["bias3"]),
        (params["w_c"], params["u_c"], params["bias4"]),
    ]
    for g, (w, u, b) in enumerate(gate_params):
        wu = wu.at[0:H, g * Hp:g * Hp + H].set(w.astype(jnp.float32))
        wu = wu.at[Hp:Hp + H, g * Hp:g * Hp + H].set(u.astype(jnp.float32))
        bias = bias.at[0, g * Hp:g * Hp + H].set(
            b.reshape(-1).astype(jnp.float32))

    # --- pack & pad activations: xh = [x | h] -> (Bp, 2*Hp) ------------------
    xh = jnp.zeros((Bp, 2 * Hp), jnp.float32)
    xh = xh.at[:B, 0:H].set(x2).at[:B, Hp:Hp + H].set(h2)
    c_prev = jnp.zeros((Bp, Hp), jnp.float32).at[:B, 0:H].set(c2)

    # --- dropout keep/scale mask (training=True semantics of F.dropout) -----
    u01 = jax.random.uniform(dropout_rng, (Bp, Hp), dtype=jnp.float32)
    drop = jnp.where(u01 >= DROPOUT_P,
                     jnp.float32(1.0 / (1.0 - DROPOUT_P)),
                     jnp.float32(0.0))

    out = pl.pallas_call(
        functools.partial(_lstm_cell_kernel, hp=Hp),
        out_shape=jax.ShapeDtypeStruct((Bp, 2 * Hp), jnp.float32),
        in_specs=[pl.BlockSpec(memory_space=pltpu.MemorySpace.VMEM)] * 5,
        out_specs=pl.BlockSpec(memory_space=pltpu.MemorySpace.VMEM),
    )(xh, c_prev, wu, bias, drop)

    h_t = out[:B, 0:H]
    c_t = out[:B, Hp:Hp + H]
    # .view(B, 1, -1)
    return h_t.reshape(B, 1, H), c_t.reshape(B, 1, H)


def init_params(key, input_size, hidden_size):
    """Deterministic init: uniform(-stdv, stdv) with stdv = 1/sqrt(hidden)."""
    stdv = 1.0 / math.sqrt(hidden_size)
    names_shapes = [
        ("w_i", (hidden_size, input_size)),
        ("w_f", (hidden_size, input_size)),
        ("w_o", (hidden_size, input_size)),
        ("w_c", (hidden_size, input_size)),
        ("u_i", (hidden_size, hidden_size)),
        ("u_f", (hidden_size, hidden_size)),
        ("u_o", (hidden_size, hidden_size)),
        ("u_c", (hidden_size, hidden_size)),
        ("bias1", (hidden_size,)),
        ("bias2", (hidden_size,)),
        ("bias3", (hidden_size,)),
        ("bias4", (hidden_size,)),
    ]
    params = {}
    keys = jax.random.split(key, len(names_shapes))
    for k, (name, shape) in zip(keys, names_shapes):
        params[name] = jax.random.uniform(
            k, shape, dtype=jnp.float32, minval=-stdv, maxval=stdv)
    return params


if __name__ == "__main__":
    # The reference module only works when input_size == hidden_size
    # (torch.mm(input, self.w_f) with w_f: (hidden, input)).
    B = 2
    INPUT_SIZE = 32
    HIDDEN_SIZE = 32

    key = jax.random.PRNGKey(0)
    kp, kx, kh, kc, kd = jax.random.split(key, 5)

    params = init_params(kp, INPUT_SIZE, HIDDEN_SIZE)

    # Inputs with a trailing dim of 1 to exercise the .view(B, -1) flatten.
    x = jax.random.normal(kx, (B, HIDDEN_SIZE, 1), dtype=jnp.float32)
    hidden = jax.random.normal(kh, (B, HIDDEN_SIZE, 1), dtype=jnp.float32)
    pre_cell = jax.random.normal(kc, (B, HIDDEN_SIZE, 1), dtype=jnp.float32)

    fwd = jax.jit(lstm_forward)
    h_t, c_t = fwd(params, x, hidden, pre_cell, kd)
    jax.block_until_ready((h_t, c_t))

    assert h_t.shape == (B, 1, HIDDEN_SIZE), h_t.shape
    assert c_t.shape == (B, 1, HIDDEN_SIZE), c_t.shape
    assert bool(jnp.all(jnp.isfinite(h_t))) and bool(jnp.all(jnp.isfinite(c_t)))
    print("KERNEL_OK")
</pallas_src>

<mosaic_0001>
module attributes {stable_mosaic.version = 11 : i64} {
  func.func @_lstm_cell_kernel(%arg0: memref<8x256xf32, #tpu.memory_space<vmem>>, %arg1: memref<8x128xf32, #tpu.memory_space<vmem>>, %arg2: memref<256x512xf32, #tpu.memory_space<vmem>>, %arg3: memref<1x512xf32, #tpu.memory_space<vmem>>, %arg4: memref<8x128xf32, #tpu.memory_space<vmem>>, %arg5: memref<8x256xf32, #tpu.memory_space<vmem>>) attributes {dimension_semantics = [], scalar_prefetch = 0 : i64, scratch_operands = 0 : i64, tpu.core_type = #tpu.core_type<tc>} {
    %c0 = arith.constant 0 : index
    %c0_0 = arith.constant 0 : index
    %0 = vector.load %arg0[%c0, %c0_0] : memref<8x256xf32, #tpu.memory_space<vmem>>, vector<8x256xf32>
    %c0_1 = arith.constant 0 : index
    %c0_2 = arith.constant 0 : index
    %1 = vector.load %arg2[%c0_1, %c0_2] : memref<256x512xf32, #tpu.memory_space<vmem>>, vector<256x512xf32>
    %cst = arith.constant dense<0.000000e+00> : vector<8x512xf32>
    %2 = tpu.matmul %0, %1, %cst {dimension_numbers = #tpu.dot_dimension_numbers<[1], [0], [0], [1], [0, 0, 1, 1], [], []>} : vector<8x256xf32>, vector<256x512xf32>, vector<8x512xf32> -> vector<8x512xf32>
    %c0_3 = arith.constant 0 : index
    %c0_4 = arith.constant 0 : index
    %3 = vector.load %arg3[%c0_3, %c0_4] : memref<1x512xf32, #tpu.memory_space<vmem>>, vector<1x512xf32>
    %4 = vector.broadcast %3 : vector<1x512xf32> to vector<8x512xf32>
    %5 = arith.addf %2, %4 : vector<8x512xf32>
    %6 = vector.extract_strided_slice %5 {offsets = [0, 0], sizes = [8, 128], strides = [1, 1]} : vector<8x512xf32> to vector<8x128xf32>
    %7 = arith.negf %6 : vector<8x128xf32>
    %8 = math.exp %7 : vector<8x128xf32>
    %cst_5 = arith.constant 1.000000e+00 : f32
    %9 = vector.broadcast %cst_5 : f32 to vector<8x128xf32>
    %10 = arith.addf %9, %8 : vector<8x128xf32>
    %11 = arith.divf %9, %10 : vector<8x128xf32>
    %12 = vector.extract_strided_slice %5 {offsets = [0, 128], sizes = [8, 128], strides = [1, 1]} : vector<8x512xf32> to vector<8x128xf32>
    %13 = arith.negf %12 : vector<8x128xf32>
    %14 = math.exp %13 : vector<8x128xf32>
    %cst_6 = arith.constant 1.000000e+00 : f32
    %15 = vector.broadcast %cst_6 : f32 to vector<8x128xf32>
    %16 = arith.addf %15, %14 : vector<8x128xf32>
    %17 = arith.divf %15, %16 : vector<8x128xf32>
    %18 = vector.extract_strided_slice %5 {offsets = [0, 256], sizes = [8, 128], strides = [1, 1]} : vector<8x512xf32> to vector<8x128xf32>
    %19 = arith.negf %18 : vector<8x128xf32>
    %20 = math.exp %19 : vector<8x128xf32>
    %cst_7 = arith.constant 1.000000e+00 : f32
    %21 = vector.broadcast %cst_7 : f32 to vector<8x128xf32>
    %22 = arith.addf %21, %20 : vector<8x128xf32>
    %23 = arith.divf %21, %22 : vector<8x128xf32>
    %24 = vector.extract_strided_slice %5 {offsets = [0, 384], sizes = [8, 128], strides = [1, 1]} : vector<8x512xf32> to vector<8x128xf32>
    %25 = math.tanh %24 : vector<8x128xf32>
    %c0_8 = arith.constant 0 : index
    %c0_9 = arith.constant 0 : index
    %26 = vector.load %arg1[%c0_8, %c0_9] : memref<8x128xf32, #tpu.memory_space<vmem>>, vector<8x128xf32>
    %27 = arith.mulf %26, %11 : vector<8x128xf32>
    %28 = arith.mulf %17, %25 : vector<8x128xf32>
    %29 = arith.addf %27, %28 : vector<8x128xf32>
    %30 = math.tanh %29 : vector<8x128xf32>
    %31 = arith.mulf %23, %30 : vector<8x128xf32>
    %c0_10 = arith.constant 0 : index
    %c0_11 = arith.constant 0 : index
    %32 = vector.load %arg4[%c0_10, %c0_11] : memref<8x128xf32, #tpu.memory_space<vmem>>, vector<8x128xf32>
    %33 = arith.mulf %31, %32 : vector<8x128xf32>
    %34 = tpu.concatenate %33, %29 in 1 : vector<8x128xf32>, vector<8x128xf32> -> vector<8x256xf32>
    %c0_12 = arith.constant 0 : index
    %c0_13 = arith.constant 0 : index
    %35 = vector.load %arg5[%c0_12, %c0_13] : memref<8x256xf32, #tpu.memory_space<vmem>>, vector<8x256xf32>
    tpu.vector_store %arg5[%c0_12, %c0_13], %34 {strides = array<i32>} : memref<8x256xf32, #tpu.memory_space<vmem>>, vector<8x256xf32>,
    return
  }
}

</mosaic_0001>

<bundles_post_ra>
// kernel: lstm_forward.1
= control target key start
LH: loop header
LB: loop body
LE: loop exit
PB: predicated region body
PF: predicated region fallthrough
CT: control target
= control target key end

     0   :  { %s929_s2 = inlined_call_operand.vmem [shape: f32[256,512], index: 2, kind: input, shape index: {}]   ;;  %s930_s0 = inlined_call_operand.vmem [shape: f32[8,256], index: 0, kind: input, shape index: {}]   ;;  %s931_s3 = inlined_call_operand.vmem [shape: f32[1,512], index: 3, kind: input, shape index: {}]   ;;  %s932_s1 = inlined_call_operand.vmem [shape: f32[8,128], index: 1, kind: input, shape index: {}]   ;;  %s933_s5 = inlined_call_operand.vmem [shape: f32[8,256], index: 5, kind: output, shape index: {}]   ;;  %s934_s4 = inlined_call_operand.vmem [shape: f32[8,128], index: 4, kind: input, shape index: {}]  }
   0x1   :  { %v23_v0 = vld [vmem:[%s929_s2 + $0x8] sm:$0xff]  ;;  %v22_v2 = vld [vmem:[%s929_s2] sm:$0xff]  ;;  %v25_v18 = vld [vmem:[%s929_s2 + $0x18] sm:$0xff] }
   0x2   :  { %v27_v1 = vld [vmem:[%s929_s2 + $0x28] sm:$0xff]  ;;  %v26_v4 = vld [vmem:[%s929_s2 + $0x20] sm:$0xff]  ;;  %v29_v19 = vld [vmem:[%s929_s2 + $0x38] sm:$0xff] }
   0x3   :  { %v350_v3 = vpack.c.bf16 %v27_v1, %v23_v0  ;;  %v31_v5 = vld [vmem:[%s929_s2 + $0x48] sm:$0xff]  ;;  %v352_v7 = vpack.c.bf16 %v26_v4, %v22_v2  ;;  %v30_v9 = vld [vmem:[%s929_s2 + $0x40] sm:$0xff]  ;;  %v414_v21 = vpack.c.bf16 %v29_v19, %v25_v18  ;;  %v24_v22 = vld [vmem:[%s929_s2 + $0x10] sm:$0xff] }
   0x4   :  { %v35_v6 = vld [vmem:[%s929_s2 + $0x68] sm:$0xff]  ;;  %v34_v10 = vld [vmem:[%s929_s2 + $0x60] sm:$0xff]  ;;  %v28_v23 = vld [vmem:[%s929_s2 + $0x30] sm:$0xff] }
   0x5   :  { %v354_v8 = vpack.c.bf16 %v35_v6, %v31_v5  ;;  %v39_v11 = vld [vmem:[%s929_s2 + $0x88] sm:$0xff]  ;;  %351 = vmatprep.subr.bf16.mxu0 %v350_v3  ;;  %v356_v13 = vpack.c.bf16 %v34_v10, %v30_v9  ;;  %v38_v14 = vld [vmem:[%s929_s2 + $0x80] sm:$0xff]  ;;  %v416_v24 = vpack.c.bf16 %v28_v23, %v24_v22  ;;  %415 = vmatprep.subr.bf16.mxu1 %v414_v21  ;;  %v33_v26 = vld [vmem:[%s929_s2 + $0x58] sm:$0xff] }
   0x6   :  { %v43_v12 = vld [vmem:[%s929_s2 + $0xa8] sm:$0xff]  ;;  %353 = vmatpush1.bf16.msra.mxu0 %v352_v7  ;;  %v42_v15 = vld [vmem:[%s929_s2 + $0xa0] sm:$0xff]  ;;  %v37_v27 = vld [vmem:[%s929_s2 + $0x78] sm:$0xff] }
   0x7   :  { %355 = vmatprep.subr.bf16.mxu0 %v354_v8  ;;  %v358_v16 = vpack.c.bf16 %v43_v12, %v39_v11  ;;  %v47_v17 = vld [vmem:[%s929_s2 + $0xc8] sm:$0xff]  ;;  %v360_v25 = vpack.c.bf16 %v42_v15, %v38_v14  ;;  %v32_v28 = vld [vmem:[%s929_s2 + $0x50] sm:$0xff]  ;;  %v46_v30 = vld [vmem:[%s929_s2 + $0xc0] sm:$0xff]  ;;  %417 = vmatpush1.bf16.msra.mxu1 %v416_v24  ;;  %v418_v32 = vpack.c.bf16 %v37_v27, %v33_v26 }
   0x8   :  { %v51_v20 = vld [vmem:[%s929_s2 + $0xe8] sm:$0xff]  ;;  %v50_v31 = vld [vmem:[%s929_s2 + $0xe0] sm:$0xff]  ;;  %v36_v33 = vld [vmem:[%s929_s2 + $0x70] sm:$0xff] }
   0x9   :  { %v362_v29 = vpack.c.bf16 %v51_v20, %v47_v17  ;;  %v55_v34 = vld [vmem:[%s929_s2 + $0x108] sm:$0xff]  ;;  %v420_v36 = vpack.c.bf16 %v36_v33, %v32_v28  ;;  %v41_v37 = vld [vmem:[%s929_s2 + $0x98] sm:$0xff]  ;;  %419 = vmatprep.subr.bf16.mxu1 %v418_v32  ;;  %v40_v39 = vld [vmem:[%s929_s2 + $0x90] sm:$0xff]  ;;  %v364_v41 = vpack.c.bf16 %v50_v31, %v46_v30 }
   0xa   :  { %357 = vmatpush1.bf16.msra.mxu0 %v356_v13  ;;  %v59_v35 = vld [vmem:[%s929_s2 + $0x128] sm:$0xff]  ;;  %v45_v38 = vld [vmem:[%s929_s2 + $0xb8] sm:$0xff]  ;;  %v44_v40 = vld [vmem:[%s929_s2 + $0xb0] sm:$0xff] }
   0xb   :  { %359 = vmatprep.subr.bf16.mxu0 %v358_v16  ;;  %v54_v42 = vld [vmem:[%s929_s2 + $0x100] sm:$0xff]  ;;  %v422_v44 = vpack.c.bf16 %v45_v38, %v41_v37  ;;  %v366_v45 = vpack.c.bf16 %v59_v35, %v55_v34  ;;  %421 = vmatpush1.bf16.msra.mxu1 %v420_v36  ;;  %v63_v46 = vld [vmem:[%s929_s2 + $0x148] sm:$0xff]  ;;  %v424_v47 = vpack.c.bf16 %v44_v40, %v40_v39  ;;  %v49_v48 = vld [vmem:[%s929_s2 + $0xd8] sm:$0xff] }
   0xc   :  { %v58_v43 = vld [vmem:[%s929_s2 + $0x120] sm:$0xff]  ;;  %v53_v49 = vld [vmem:[%s929_s2 + $0xf8] sm:$0xff]  ;;  %v67_v50 = vld [vmem:[%s929_s2 + $0x168] sm:$0xff] }
   0xd   :  { %423 = vmatprep.subr.bf16.mxu1 %v422_v44  ;;  %v426_v51 = vpack.c.bf16 %v53_v49, %v49_v48  ;;  %v48_v52 = vld [vmem:[%s929_s2 + $0xd0] sm:$0xff]  ;;  %v368_v54 = vpack.c.bf16 %v58_v43, %v54_v42  ;;  %v57_v55 = vld [vmem:[%s929_s2 + $0x118] sm:$0xff]  ;;  %v370_v57 = vpack.c.bf16 %v67_v50, %v63_v46  ;;  %v62_v58 = vld [vmem:[%s929_s2 + $0x140] sm:$0xff] }
   0xe   :  { %361 = vmatpush1.bf16.msra.mxu0 %v360_v25  ;;  %v52_v53 = vld [vmem:[%s929_s2 + $0xf0] sm:$0xff]  ;;  %v61_v56 = vld [vmem:[%s929_s2 + $0x138] sm:$0xff]  ;;  %v66_v59 = vld [vmem:[%s929_s2 + $0x160] sm:$0xff] }
   0xf   :  { %363 = vmatprep.subr.bf16.mxu0 %v362_v29  ;;  %425 = vmatpush1.bf16.msra.mxu1 %v424_v47  ;;  %v71_v60 = vld [vmem:[%s929_s2 + $0x188] sm:$0xff]  ;;  %v428_v61 = vpack.c.bf16 %v52_v53, %v48_v52  ;;  %v430_v63 = vpack.c.bf16 %v61_v56, %v57_v55  ;;  %v56_v0 = vld [vmem:[%s929_s2 + $0x110] sm:$0xff]  ;;  %v65_v2 = vld [vmem:[%s929_s2 + $0x158] sm:$0xff]  ;;  %v372_v4 = vpack.c.bf16 %v66_v59, %v62_v58 }
  0x10   :  { %v75_v62 = vld [vmem:[%s929_s2 + $0x1a8] sm:$0xff]  ;;  %427 = vmatprep.subr.bf16.mxu1 %v426_v51  ;;  %v60_v1 = vld [vmem:[%s929_s2 + $0x130] sm:$0xff]  ;;  %v69_v3 = vld [vmem:[%s929_s2 + $0x178] sm:$0xff] }
  0x11   :  { %v374_v5 = vpack.c.bf16 %v75_v62, %v71_v60  ;;  %v70_v6 = vld [vmem:[%s929_s2 + $0x180] sm:$0xff]  ;;  %v79_v8 = vld [vmem:[%s929_s2 + $0x1c8] sm:$0xff]  ;;  %v432_v9 = vpack.c.bf16 %v60_v1, %v56_v0  ;;  %v434_v11 = vpack.c.bf16 %v69_v3, %v65_v2  ;;  %v64_v12 = vld [vmem:[%s929_s2 + $0x150] sm:$0xff] }
  0x12   :  { %365 = vmatpush1.bf16.msra.mxu0 %v364_v41  ;;  %v74_v7 = vld [vmem:[%s929_s2 + $0x1a0] sm:$0xff]  ;;  %v83_v10 = vld [vmem:[%s929_s2 + $0x1e8] sm:$0xff]  ;;  %v68_v13 = vld [vmem:[%s929_s2 + $0x170] sm:$0xff] }
  0x13   :  { %367 = vmatprep.subr.bf16.mxu0 %v366_v45  ;;  %429 = vmatpush1.bf16.msra.mxu1 %v428_v61  ;;  %v73_v14 = vld [vmem:[%s929_s2 + $0x198] sm:$0xff]  ;;  %v376_v16 = vpack.c.bf16 %v74_v7, %v70_v6  ;;  %v378_v17 = vpack.c.bf16 %v83_v10, %v79_v8  ;;  %v78_v18 = vld [vmem:[%s929_s2 + $0x1c0] sm:$0xff]  ;;  %v87_v20 = vld [vmem:[%s929_s2 + $0x208] sm:$0xff]  ;;  %v436_v21 = vpack.c.bf16 %v68_v13, %v64_v12 }
  0x14   :  { %431 = vmatprep.subr.bf16.mxu1 %v430_v63  ;;  %v77_v15 = vld [vmem:[%s929_s2 + $0x1b8] sm:$0xff]  ;;  %v82_v19 = vld [vmem:[%s929_s2 + $0x1e0] sm:$0xff]  ;;  %v91_v22 = vld [vmem:[%s929_s2 + $0x228] sm:$0xff] }
  0x15   :  { %v438_v23 = vpack.c.bf16 %v77_v15, %v73_v14  ;;  %v72_v24 = vld [vmem:[%s929_s2 + $0x190] sm:$0xff]  ;;  %v81_v26 = vld [vmem:[%s929_s2 + $0x1d8] sm:$0xff]  ;;  %v380_v28 = vpack.c.bf16 %v82_v19, %v78_v18  ;;  %v382_v29 = vpack.c.bf16 %v91_v22, %v87_v20  ;;  %v86_v30 = vld [vmem:[%s929_s2 + $0x200] sm:$0xff] }
  0x16   :  { %369 = vmatpush1.bf16.msra.mxu0 %v368_v54  ;;  %v76_v25 = vld [vmem:[%s929_s2 + $0x1b0] sm:$0xff]  ;;  %v85_v27 = vld [vmem:[%s929_s2 + $0x1f8] sm:$0xff]  ;;  %v90_v31 = vld [vmem:[%s929_s2 + $0x220] sm:$0xff] }
  0x17   :  { %371 = vmatprep.subr.bf16.mxu0 %v370_v57  ;;  %433 = vmatpush1.bf16.msra.mxu1 %v432_v9  ;;  %v95_v32 = vld [vmem:[%s929_s2 + $0x248] sm:$0xff]  ;;  %v440_v33 = vpack.c.bf16 %v76_v25, %v72_v24  ;;  %v442_v35 = vpack.c.bf16 %v85_v27, %v81_v26  ;;  %v80_v36 = vld [vmem:[%s929_s2 + $0x1d0] sm:$0xff]  ;;  %v89_v38 = vld [vmem:[%s929_s2 + $0x218] sm:$0xff]  ;;  %v384_v40 = vpack.c.bf16 %v90_v31, %v86_v30 }
  0x18   :  { %435 = vmatprep.subr.bf16.mxu1 %v434_v11  ;;  %v99_v34 = vld [vmem:[%s929_s2 + $0x268] sm:$0xff]  ;;  %v84_v37 = vld [vmem:[%s929_s2 + $0x1f0] sm:$0xff]  ;;  %v93_v39 = vld [vmem:[%s929_s2 + $0x238] sm:$0xff] }
  0x19   :  { %v386_v41 = vpack.c.bf16 %v99_v34, %v95_v32  ;;  %v94_v42 = vld [vmem:[%s929_s2 + $0x240] sm:$0xff]  ;;  %v103_v44 = vld [vmem:[%s929_s2 + $0x288] sm:$0xff]  ;;  %v444_v45 = vpack.c.bf16 %v84_v37, %v80_v36  ;;  %v446_v47 = vpack.c.bf16 %v93_v39, %v89_v38  ;;  %v88_v48 = vld [vmem:[%s929_s2 + $0x210] sm:$0xff] }
  0x1a   :  { %373 = vmatpush1.bf16.msra.mxu0 %v372_v4  ;;  %v98_v43 = vld [vmem:[%s929_s2 + $0x260] sm:$0xff]  ;;  %v107_v46 = vld [vmem:[%s929_s2 + $0x2a8] sm:$0xff]  ;;  %v92_v49 = vld [vmem:[%s929_s2 + $0x230] sm:$0xff] }
  0x1b   :  { %375 = vmatprep.subr.bf16.mxu0 %v374_v5  ;;  %437 = vmatpush1.bf16.msra.mxu1 %v436_v21  ;;  %v97_v50 = vld [vmem:[%s929_s2 + $0x258] sm:$0xff]  ;;  %v388_v52 = vpack.c.bf16 %v98_v43, %v94_v42  ;;  %v102_v53 = vld [vmem:[%s929_s2 + $0x280] sm:$0xff]  ;;  %v390_v54 = vpack.c.bf16 %v107_v46, %v103_v44  ;;  %v111_v56 = vld [vmem:[%s929_s2 + $0x2c8] sm:$0xff]  ;;  %v448_v58 = vpack.c.bf16 %v92_v49, %v88_v48 }
  0x1c   :  { %439 = vmatprep.subr.bf16.mxu1 %v438_v23  ;;  %v101_v51 = vld [vmem:[%s929_s2 + $0x278] sm:$0xff]  ;;  %v106_v55 = vld [vmem:[%s929_s2 + $0x2a0] sm:$0xff]  ;;  %v115_v57 = vld [vmem:[%s929_s2 + $0x2e8] sm:$0xff] }
  0x1d   :  { %v450_v59 = vpack.c.bf16 %v101_v51, %v97_v50  ;;  %v96_v60 = vld [vmem:[%s929_s2 + $0x250] sm:$0xff]  ;;  %v21_v62 = vld [vmem:[%s930_s0 + $0x8] sm:$0xff]  ;;  %v105_v63 = vld [vmem:[%s929_s2 + $0x298] sm:$0xff]  ;;  %v392_v1 = vpack.c.bf16 %v106_v55, %v102_v53  ;;  %v394_v2 = vpack.c.bf16 %v115_v57, %v111_v56 }
  0x1e   :  { %377 = vmatpush1.bf16.msra.mxu0 %v376_v16  ;;  %v100_v61 = vld [vmem:[%s929_s2 + $0x270] sm:$0xff]  ;;  %v109_v0 = vld [vmem:[%s929_s2 + $0x2b8] sm:$0xff]  ;;  %236 = vmatprep.mubr.f32.mxu0 %v21_v62  ;;  %v110_v3 = vld [vmem:[%s929_s2 + $0x2c0] sm:$0xff] }
  0x1f   :  { %379 = vmatprep.subr.bf16.mxu0 %v378_v17  ;;  %441 = vmatpush1.bf16.msra.mxu1 %v440_v33  ;;  %v114_v4 = vld [vmem:[%s929_s2 + $0x2e0] sm:$0xff]  ;;  %v119_v5 = vld [vmem:[%s929_s2 + $0x308] sm:$0xff]  ;;  %v452_v6 = vpack.c.bf16 %v100_v61, %v96_v60  ;;  %v454_v8 = vpack.c.bf16 %v109_v0, %v105_v63  ;;  %v104_v9 = vld [vmem:[%s929_s2 + $0x290] sm:$0xff] }
  0x20   :  { %443 = vmatprep.subr.bf16.mxu1 %v442_v35  ;;  %307 = vmatprep.mubr.f32.mxu1 %v21_v62  ;;  %v123_v7 = vld [vmem:[%s929_s2 + $0x328] sm:$0xff]  ;;  %v108_v10 = vld [vmem:[%s929_s2 + $0x2b0] sm:$0xff]  ;;  %v113_v11 = vld [vmem:[%s929_s2 + $0x2d8] sm:$0xff]  ;;  %v396_v13 = vpack.c.bf16 %v114_v4, %v110_v3 }
  0x21   :  { %v117_v12 = vld [vmem:[%s929_s2 + $0x2f8] sm:$0xff]  ;;  %v398_v14 = vpack.c.bf16 %v123_v7, %v119_v5  ;;  %v118_v15 = vld [vmem:[%s929_s2 + $0x300] sm:$0xff]  ;;  %v127_v17 = vld [vmem:[%s929_s2 + $0x348] sm:$0xff]  ;;  %v456_v18 = vpack.c.bf16 %v108_v10, %v104_v9 }
  0x22   :  { %381 = vmatpush1.bf16.msra.mxu0 %v380_v28  ;;  %v122_v16 = vld [vmem:[%s929_s2 + $0x320] sm:$0xff]  ;;  %v131_v19 = vld [vmem:[%s929_s2 + $0x368] sm:$0xff]  ;;  %v458_v20 = vpack.c.bf16 %v117_v12, %v113_v11  ;;  %v112_v21 = vld [vmem:[%s929_s2 + $0x2d0] sm:$0xff] }
  0x23   :  { %383 = vmatprep.subr.bf16.mxu0 %v382_v29  ;;  %445 = vmatpush1.bf16.msra.mxu1 %v444_v45  ;;  %v116_v22 = vld [vmem:[%s929_s2 + $0x2f0] sm:$0xff]  ;;  %v121_v23 = vld [vmem:[%s929_s2 + $0x318] sm:$0xff]  ;;  %v400_v25 = vpack.c.bf16 %v122_v16, %v118_v15  ;;  %v402_v26 = vpack.c.bf16 %v131_v19, %v127_v17  ;;  %v126_v27 = vld [vmem:[%s929_s2 + $0x340] sm:$0xff] }
  0x24   :  { %447 = vmatprep.subr.bf16.mxu1 %v446_v47  ;;  %v125_v24 = vld [vmem:[%s929_s2 + $0x338] sm:$0xff]  ;;  %v130_v28 = vld [vmem:[%s929_s2 + $0x360] sm:$0xff]  ;;  %v135_v29 = vld [vmem:[%s929_s2 + $0x388] sm:$0xff]  ;;  %v460_v30 = vpack.c.bf16 %v116_v22, %v112_v21 }
  0x25   :  { %v139_v31 = vld [vmem:[%s929_s2 + $0x3a8] sm:$0xff]  ;;  %v462_v32 = vpack.c.bf16 %v125_v24, %v121_v23  ;;  %v120_v33 = vld [vmem:[%s929_s2 + $0x310] sm:$0xff]  ;;  %v129_v35 = vld [vmem:[%s929_s2 + $0x358] sm:$0xff]  ;;  %v404_v37 = vpack.c.bf16 %v130_v28, %v126_v27 }
  0x26   :  { %385 = vmatpush1.bf16.msra.mxu0 %v384_v40  ;;  %v124_v34 = vld [vmem:[%s929_s2 + $0x330] sm:$0xff]  ;;  %v133_v36 = vld [vmem:[%s929_s2 + $0x378] sm:$0xff]  ;;  %v406_v38 = vpack.c.bf16 %v139_v31, %v135_v29  ;;  %v134_v39 = vld [vmem:[%s929_s2 + $0x380] sm:$0xff] }
  0x27   :  { %387 = vmatprep.subr.bf16.mxu0 %v386_v41  ;;  %449 = vmatpush1.bf16.msra.mxu1 %v448_v58  ;;  %v138_v40 = vld [vmem:[%s929_s2 + $0x3a0] sm:$0xff]  ;;  %v143_v41 = vld [vmem:[%s929_s2 + $0x3c8] sm:$0xff]  ;;  %v464_v42 = vpack.c.bf16 %v124_v34, %v120_v33  ;;  %v466_v44 = vpack.c.bf16 %v133_v36, %v129_v35  ;;  %v128_v45 = vld [vmem:[%s929_s2 + $0x350] sm:$0xff] }
  0x28   :  { %451 = vmatprep.subr.bf16.mxu1 %v450_v59  ;;  %v147_v43 = vld [vmem:[%s929_s2 + $0x3e8] sm:$0xff]  ;;  %v132_v46 = vld [vmem:[%s929_s2 + $0x370] sm:$0xff]  ;;  %v137_v47 = vld [vmem:[%s929_s2 + $0x398] sm:$0xff]  ;;  %v408_v49 = vpack.c.bf16 %v138_v40, %v134_v39 }
  0x29   :  { %v141_v48 = vld [vmem:[%s929_s2 + $0x3b8] sm:$0xff]  ;;  %v410_v50 = vpack.c.bf16 %v147_v43, %v143_v41  ;;  %v142_v51 = vld [vmem:[%s929_s2 + $0x3c0] sm:$0xff]  ;;  %v468_v53 = vpack.c.bf16 %v132_v46, %v128_v45  ;;  %v136_v55 = vld [vmem:[%s929_s2 + $0x390] sm:$0xff] }
  0x2a   :  { %389 = vmatpush1.bf16.msra.mxu0 %v388_v52  ;;  %v146_v52 = vld [vmem:[%s929_s2 + $0x3e0] sm:$0xff]  ;;  %v140_v56 = vld [vmem:[%s929_s2 + $0x3b0] sm:$0xff]  ;;  %v145_v57 = vld [vmem:[%s929_s2 + $0x3d8] sm:$0xff] }
  0x2b   :  { %391 = vmatprep.subr.bf16.mxu0 %v390_v54  ;;  %453 = vmatpush1.bf16.msra.mxu1 %v452_v6  ;;  %v470_v54 = vpack.c.bf16 %v141_v48, %v137_v47  ;;  %v149_v58 = vld [vmem:[%s929_s2 + $0x3f8] sm:$0xff]  ;;  %v412_v59 = vpack.c.bf16 %v146_v52, %v142_v51  ;;  %v472_v60 = vpack.c.bf16 %v140_v56, %v136_v55  ;;  %v144_v62 = vld [vmem:[%s929_s2 + $0x3d0] sm:$0xff]  ;;  %v20_v0 = vld [vmem:[%s930_s0] sm:$0xff] }
  0x2c   :  { %455 = vmatprep.subr.bf16.mxu1 %v454_v8  ;;  %v474_v61 = vpack.c.bf16 %v149_v58, %v145_v57  ;;  %v148_v63 = vld [vmem:[%s929_s2 + $0x3f0] sm:$0xff]  ;;  %v150_v5 = vld [vmem:[%s931_s3] sm:$0xf] }
  0x2d   :  { %v333_v29 = vld [vmem:[%s932_s1] sm:$0xff] }
  0x2e   :  { %393 = vmatpush1.bf16.msra.mxu0 %v392_v1  ;;  %v476_v1 = vpack.c.bf16 %v148_v63, %v144_v62  ;;  %v339_v39 = vld [vmem:[%s934_s4] sm:$0xff] }
  0x2f   :  { %395 = vmatprep.subr.bf16.mxu0 %v394_v2  ;;  %457 = vmatpush1.bf16.msra.mxu1 %v456_v18  ;;  %v152_v2 = vlaneseq }
  0x30   :  { %459 = vmatprep.subr.bf16.mxu1 %v458_v20 }
  0x31   :  { %v153_v3 = vshrl.u32 %v152_v2, 7 }
  0x32   :  { %397 = vmatpush1.bf16.msra.mxu0 %v396_v13 }
  0x33   :  { %399 = vmatprep.subr.bf16.mxu0 %v398_v14  ;;  %461 = vmatpush1.bf16.msra.mxu1 %v460_v30  ;;  %v154_v4 = vsub.s32 0, %v153_v3  ;;  %v158_v6 = vsub.s32 1, %v153_v3  ;;  %v162_v9 = vsub.s32 2, %v153_v3  ;;  %v166_v18 = vsub.s32 3, %v153_v3 }
  0x34   :  { %463 = vmatprep.subr.bf16.mxu1 %v462_v32 }
  0x35   :  { %v155_v7 = vrot.slane %v150_v5, %v154_v4  ;;  %v159_v8 = vrot.slane %v150_v5, %v158_v6  ;;  %v163_v15 = vrot.slane %v150_v5, %v162_v9  ;;  %v167_v21 = vrot.slane %v150_v5, %v166_v18 }
  0x36   :  { %401 = vmatpush1.bf16.msra.mxu0 %v400_v25 }
  0x37   :  { %403 = vmatprep.subr.bf16.mxu0 %v402_v26  ;;  %465 = vmatpush1.bf16.msra.mxu1 %v464_v42 }
  0x38   :  { %467 = vmatprep.subr.bf16.mxu1 %v466_v44 }
  0x3a   :  { %405 = vmatpush1.bf16.msra.mxu0 %v404_v37 }
  0x3b   :  { %407 = vmatprep.subr.bf16.mxu0 %v406_v38  ;;  %469 = vmatpush1.bf16.msra.mxu1 %v468_v53 }
  0x3c   :  { %471 = vmatprep.subr.bf16.mxu1 %v470_v54 }
  0x3e   :  { %409 = vmatpush1.bf16.msra.mxu0 %v408_v49 }
  0x3f   :  { %411 = vmatprep.subr.bf16.mxu0 %v410_v50  ;;  %473 = vmatpush1.bf16.msra.mxu1 %v472_v60 }
  0x40   :  { %475 = vmatprep.subr.bf16.mxu1 %v474_v61 }
  0x42   :  { %413 = vmatpush1.bf16.msra.mxu0 %v412_v59 }
  0x43   :  { %477 = vmatpush1.bf16.msra.mxu1 %v476_v1 }
  0x45   :  { %237 = vmatmul.mubr.f32.vlgmr.msra.gmra.mrb[0].mxu0 %v20_v0 }
  0x46   :  { %308 = vmatmul.mubr.f32.vlgmr.msra.gmra.mrb[0].mxu1 %v20_v0 }
 0x118   :  { %v238_v10 = vpop.f32.mrb[0].mxu0 }
 0x119   :  { %v239_v11 = vadd.f32 %v238_v10, %v155_v7  ;;  %v240_v12 = vpop.f32.mrb[1].mxu0  ;;  %v309_v17 = vpop.f32.mrb[0].mxu1 }
 0x11a   :  { %v241_v13 = vadd.f32 %v240_v12, %v159_v8  ;;  %v311_v19 = vpop.f32.mrb[1].mxu1  ;;  %v310_v20 = vadd.f32 %v309_v17, %v163_v15 }
 0x11b   :  { %v347_v14 = vmul.f32 -1.442695, %v239_v11  ;;  %v312_v23 = vadd.f32 %v311_v19, %v167_v21 }
 0x11c   :  { %v348_v16 = vmul.f32 -1.442695, %v241_v13  ;;  %v349_v22 = vmul.f32 -1.442695, %v310_v20 }
 0x11d   :  { %478 = vpow2.f32 %v347_v14 }
 0x11e   :  { %480 = vpow2.f32 %v348_v16 }
 0x11f   :  { %482 = vpow2.f32 %v349_v22 }
 0x120   :  { %484 = vtanh.f32 %v312_v23 }
 0x127   :  { %v479_v24 = vpop.eup %478 }
 0x128   :  { %v481_v25 = vpop.eup %480  ;;  %v317_v26 = vadd.f32 1.0, %v479_v24 }
 0x129   :  { %v323_v27 = vadd.f32 1.0, %v481_v25  ;;  %v483_v28 = vpop.eup %482 }
 0x12a   :  { %486 = vrcp.f32 %v317_v26  ;;  %v485_v30 = vpop.eup %484  ;;  %v329_v32 = vadd.f32 1.0, %v483_v28 }
 0x12b   :  { %488 = vrcp.f32 %v323_v27 }
 0x12c   :  { %490 = vrcp.f32 %v329_v32 }
 0x134   :  { %v487_v31 = vpop.eup %486 }
 0x135   :  { %v489_v33 = vpop.eup %488  ;;  %v334_v34 = vmul.f32 %v487_v31, %v333_v29 }
 0x136   :  { %v335_v35 = vmul.f32 %v489_v33, %v485_v30  ;;  %v491_v37 = vpop.eup %490 }
 0x138   :  { %v336_v36 = vadd.f32 %v335_v35, %v334_v34 }
 0x13a   :  { %492 = vtanh.f32 %v336_v36  ;;  %342 = vst [vmem:[%s933_s5 + $0x8] sm:$0xff] %v336_v36 }
 0x144   :  { %v493_v38 = vpop.eup %492 }
 0x145   :  { %v338_v40 = vmul.f32 %v493_v38, %v491_v37 }
 0x147   :  { %v340_v41 = vmul.f32 %v339_v39, %v338_v40 }
 0x149   :  { %341 = vst [vmem:[%s933_s5] sm:$0xff] %v340_v41 }

</bundles_post_ra>
